<compile_context>
chip_gen: v6e
topology: v6e:2x2x1
jax: 0.10.0
libtpu: 0.0.40
codegen_flags: <defaults>
</compile_context>

<pallas_src>
import math
import functools

import jax
import jax.numpy as jnp
from jax.experimental import pallas as pl
from jax.experimental.pallas import tpu as pltpu


def _vmem_capacity_bytes():
    """Per-TensorCore VMEM capacity; safe fallback (128 MiB) if the query fails."""
    try:
        return int(pltpu.get_tpu_info().vmem_capacity_bytes)
    except Exception:
        return 128 << 20


_VMEM_CAPACITY = _vmem_capacity_bytes()
# Generation-aware token tile: 256 on 64 MiB parts (v7x), 512 on v5e/v6e (128 MiB).
_TM = 256 if _VMEM_CAPACITY <= (64 << 20) else 512


def _working_set_bytes(tm, th, C, H):
    """Exact-ish VMEM working set for one kernel instance (no 2x fudge factor)."""
    x_buf = 2 * tm * C * 4               # x tile, double-buffered (f32 worst case)
    o_buf = 2 * tm * C * 4               # out tile, double-buffered
    w1_buf = 2 * C * th * 2              # bf16 w1 chunk, double-buffered
    w2_buf = 2 * th * C * 2              # bf16 w2 chunk, double-buffered
    b_buf = 2 * th * 4 + 2 * C * 4       # b1 chunk + b2
    acc = tm * C * 4                     # fc2 accumulator scratch
    temps = tm * th * 4 + tm * th * 2 + tm * C * 2   # f32 GELU chunk + bf16 temporaries
    return x_buf + o_buf + w1_buf + w2_buf + b_buf + acc + temps


def _pick_th(tm, C, H, budget):
    """Largest hidden chunk fitting the VMEM budget.  th == H -> weights fetched once
    (resident behaviour); th < H -> weight chunks stream along the H grid axis."""
    for th in (H, 2048, 1024, 512, 256, 128):
        if th > H or (th != H and H % th != 0):
            continue
        if _working_set_bytes(tm, th, C, H) <= budget:
            return th
    return 128 if H % 128 == 0 else H    # fallback; realistic configs never hit this


def _mlp_kernel(x_ref, w1_ref, b1_ref, w2_ref, b2_ref, o_ref, acc_ref, *, approx_gelu):
    # Grid = (M tiles, H chunks).  x tile + fc2 accumulator stay resident across the
    # H axis (constant block index); w1/b1/w2 chunks stream.  Output is written only
    # on the last H step.
    hi = pl.program_id(1)

    @pl.when(hi == 0)
    def _():
        acc_ref[...] = jnp.zeros_like(acc_ref)

    x = x_ref[...].astype(jnp.bfloat16)

    # fc1 chunk on the MXU (bf16 inputs, f32 accumulate) + bias, in f32
    a = jnp.dot(x, w1_ref[...], preferred_element_type=jnp.float32) + b1_ref[...]

    if approx_gelu:
        # tanh-approx GELU: transcendental lands on the EUP slot (v6e/v7x VALU relief)
        a = jax.nn.gelu(a, approximate=True)
    else:
        # exact erf GELU == torch.nn.GELU(approximate='none')
        a = 0.5 * a * (1.0 + jax.lax.erf(a * (1.0 / math.sqrt(2.0))))

    # fc2 partial on the MXU, accumulated in the f32 scratch
    acc_ref[...] += jnp.dot(a.astype(jnp.bfloat16), w2_ref[...],
                            preferred_element_type=jnp.float32)

    @pl.when(hi == pl.num_programs(1) - 1)
    def _():
        # Dropout: identity (inference mode)
        o_ref[...] = (acc_ref[...] + b2_ref[...]).astype(o_ref.dtype)


@functools.partial(jax.jit, static_argnames=("approx_gelu",))
def mlp_forward(x, w1, b1, w2, b2, *, approx_gelu=False):
    """x: (B, T, C). w1: (C, 4C), w2: (4C, C) (transpose of torch layout).
    Output dtype == x.dtype (pass bf16 activations for bf16-in/bf16-out streaming)."""
    B, T, C = x.shape
    M = B * T
    H = w1.shape[1]

    # Weights are DMA'd as bf16 (native MXU dtype, halves weight bytes); biases f32.
    w1b = w1.astype(jnp.bfloat16)
    w2b = w2.astype(jnp.bfloat16)
    b1f = b1.astype(jnp.float32).reshape(1, H)
    b2f = b2.astype(jnp.float32).reshape(1, C)

    x2d = x.reshape(M, C)

    # --- token tiling (pad M to a tile boundary; padded rows discarded) ---
    if M <= _TM:
        tm, m_pad = M, M          # single tile == full dim (always layout-legal)
    else:
        tm = _TM
        m_pad = pl.cdiv(M, _TM) * _TM
        if m_pad != M:
            x2d = jnp.pad(x2d, ((0, m_pad - M), (0, 0)))
    num_m = m_pad // tm

    # --- hidden-chunk selection: resident (th == H) vs streamed (th < H) ---
    budget = int(0.8 * _VMEM_CAPACITY)
    th = _pick_th(tm, C, H, budget)
    num_h = H // th

    # --- VMEM limit: exact working set + margin, clamped to 0.9 * capacity ---
    ws = _working_set_bytes(tm, th, C, H)
    vmem_limit = int(min(max(ws + (8 << 20), 32 << 20), int(0.9 * _VMEM_CAPACITY)))

    itemsize = x.dtype.itemsize
    weight_bytes = w1b.size * 2 + w2b.size * 2 + b1f.size * 4 + b2f.size * 4
    weight_passes = 1 if th == H else num_m   # streamed chunks re-fetch per M tile
    cost = pl.CostEstimate(
        flops=4 * m_pad * C * H,              # two matmuls, 2*M*C*H each
        transcendentals=m_pad * H,            # one erf/tanh per hidden activation
        bytes_accessed=x2d.size * itemsize + m_pad * C * itemsize
                       + weight_bytes * weight_passes,
    )

    out2d = pl.pallas_call(
        functools.partial(_mlp_kernel, approx_gelu=approx_gelu),
        out_shape=jax.ShapeDtypeStruct((m_pad, C), x.dtype),
        grid_spec=pltpu.PrefetchScalarGridSpec(
            num_scalar_prefetch=0,
            grid=(num_m, num_h),
            in_specs=[
                pl.BlockSpec((tm, C), lambda i, h: (i, 0)),   # x tile (resident over H)
                pl.BlockSpec((C, th), lambda i, h: (0, h)),   # w1 chunk (bf16)
                pl.BlockSpec((1, th), lambda i, h: (0, h)),   # b1 chunk
                pl.BlockSpec((th, C), lambda i, h: (h, 0)),   # w2 chunk (bf16)
                pl.BlockSpec((1, C), lambda i, h: (0, 0)),    # b2 (tiny, constant)
            ],
            out_specs=pl.BlockSpec((tm, C), lambda i, h: (i, 0)),
            scratch_shapes=[pltpu.VMEM((tm, C), jnp.float32)],   # fc2 accumulator
        ),
        compiler_params=pltpu.CompilerParams(
            dimension_semantics=("parallel", "arbitrary"),   # M tiles across TCs, H reduce
            vmem_limit_bytes=vmem_limit,
        ),
        cost_estimate=cost,
    )(x2d, w1b, b1f, w2b, b2f)

    if m_pad != M:
        out2d = out2d[:M]
    return out2d.reshape(B, T, C)


def init_mlp_params(key, n_embd, bias=True, dtype=jnp.float32):
    """Deterministic init mirroring torch.nn.Linear defaults (U[-1/sqrt(fan_in), +])."""
    hidden = 4 * n_embd
    k1, k2, k3, k4 = jax.random.split(key, 4)
    bound1 = 1.0 / math.sqrt(n_embd)
    bound2 = 1.0 / math.sqrt(hidden)
    # stored as (in, out) — transpose of torch's (out, in)
    w1 = jax.random.uniform(k1, (n_embd, hidden), dtype, -bound1, bound1)
    b1 = (jax.random.uniform(k2, (1, hidden), dtype, -bound1, bound1)
          if bias else jnp.zeros((1, hidden), dtype))
    w2 = jax.random.uniform(k3, (hidden, n_embd), dtype, -bound2, bound2)
    b2 = (jax.random.uniform(k4, (1, n_embd), dtype, -bound2, bound2)
          if bias else jnp.zeros((1, n_embd), dtype))
    return w1, b1, w2, b2


def _reference_mirror(x, w1, b1, w2, b2):
    """Pure-JAX reference mirroring the kernel precision (bf16 MXU inputs, f32 acc)."""
    B, T, C = x.shape
    x2 = x.reshape(B * T, C).astype(jnp.bfloat16)
    h = jnp.dot(x2, w1.astype(jnp.bfloat16),
                preferred_element_type=jnp.float32) + b1.astype(jnp.float32)
    h = 0.5 * h * (1.0 + jax.lax.erf(h * (1.0 / math.sqrt(2.0))))
    y = jnp.dot(h.astype(jnp.bfloat16), w2.astype(jnp.bfloat16),
                preferred_element_type=jnp.float32) + b2.astype(jnp.float32)
    return y.reshape(B, T, C)


def _reference_f32(x, w1, b1, w2, b2):
    """True f32 reference (torch semantics) — documents the bf16-MXU precision contract."""
    B, T, C = x.shape
    x2 = x.reshape(B * T, C)
    h = jnp.dot(x2, w1, precision=jax.lax.Precision.HIGHEST) + b1
    h = 0.5 * h * (1.0 + jax.lax.erf(h * (1.0 / math.sqrt(2.0))))
    y = jnp.dot(h, w2, precision=jax.lax.Precision.HIGHEST) + b2
    return y.reshape(B, T, C)


if __name__ == "__main__":
    # config: n_embd=128 (lane-dense output, full-width MXU contraction), bias=True,
    # dropout=0.0 (inference).  Small shapes: B=2, T=8.
    B, T, C = 2, 8, 128
    key = jax.random.PRNGKey(0)
    kx, kp = jax.random.split(key)
    x = jax.random.normal(kx, (B, T, C), jnp.float32)
    w1, b1, w2, b2 = init_mlp_params(kp, C, bias=True)

    out = mlp_forward(x, w1, b1, w2, b2)
    out = jax.block_until_ready(out)
    assert out.shape == (B, T, C)

    ref_mirror = _reference_mirror(x, w1, b1, w2, b2)
    ref_f32 = _reference_f32(x, w1, b1, w2, b2)
    assert jnp.allclose(out, ref_mirror, atol=2e-3, rtol=2e-3), \
        "mismatch vs bf16-MXU-precision reference"
    assert jnp.allclose(out, ref_f32, atol=3e-2, rtol=3e-2), \
        "mismatch vs f32 reference (precision contract)"
    print("KERNEL_OK")
</pallas_src>

<mosaic_0001>
module attributes {stable_mosaic.version = 11 : i64} {
  func.func @_mlp_kernel(%arg0: i32, %arg1: i32, %arg2: memref<16x128xf32, #tpu.memory_space<vmem>>, %arg3: memref<128x512xbf16, #tpu.memory_space<vmem>>, %arg4: memref<1x512xf32, #tpu.memory_space<vmem>>, %arg5: memref<512x128xbf16, #tpu.memory_space<vmem>>, %arg6: memref<1x128xf32, #tpu.memory_space<vmem>>, %arg7: memref<16x128xf32, #tpu.memory_space<vmem>>, %arg8: memref<16x128xf32, #tpu.memory_space<vmem>>) attributes {dimension_semantics = [#tpu.dimension_semantics<parallel>, #tpu.dimension_semantics<arbitrary>], iteration_bounds = array<i64: 1, 1>, scalar_prefetch = 0 : i64, scratch_operands = 1 : i64, tpu.core_type = #tpu.core_type<tc>, window_params = [{transform_indices = @transform_0, window_bounds = array<i64: 16, 128>}, {transform_indices = @transform_1, window_bounds = array<i64: 128, 512>}, {transform_indices = @transform_2, window_bounds = array<i64: 1, 512>}, {transform_indices = @transform_3, window_bounds = array<i64: 512, 128>}, {pipeline_mode = #tpu.pipeline_mode<synchronous>, transform_indices = @transform_4, window_bounds = array<i64: 1, 128>}, {transform_indices = @transform_5, window_bounds = array<i64: 16, 128>}]} {
    %c0_i32 = arith.constant 0 : i32
    %0 = arith.cmpi eq, %arg1, %c0_i32 : i32
    %1 = arith.extui %0 : i1 to i32
    %c0_i32_0 = arith.constant 0 : i32
    %2 = arith.cmpi ne, %1, %c0_i32_0 : i32
    scf.if %2 {
      %cst_18 = arith.constant 0.000000e+00 : f32
      %27 = vector.broadcast %cst_18 : f32 to vector<16x128xf32>
      %c0_19 = arith.constant 0 : index
      %c0_20 = arith.constant 0 : index
      %28 = vector.load %arg8[%c0_19, %c0_20] : memref<16x128xf32, #tpu.memory_space<vmem>>, vector<16x128xf32>
      tpu.vector_store %arg8[%c0_19, %c0_20], %27 {strides = array<i32>} : memref<16x128xf32, #tpu.memory_space<vmem>>, vector<16x128xf32>,
    } else {
    }
    %c0 = arith.constant 0 : index
    %c0_1 = arith.constant 0 : index
    %3 = vector.load %arg2[%c0, %c0_1] : memref<16x128xf32, #tpu.memory_space<vmem>>, vector<16x128xf32>
    %4 = arith.truncf %3 : vector<16x128xf32> to vector<16x128xbf16>
    %c0_2 = arith.constant 0 : index
    %c0_3 = arith.constant 0 : index
    %5 = vector.load %arg3[%c0_2, %c0_3] : memref<128x512xbf16, #tpu.memory_space<vmem>>, vector<128x512xbf16>
    %cst = arith.constant dense<0.000000e+00> : vector<16x512xf32>
    %6 = tpu.matmul %4, %5, %cst {dimension_numbers = #tpu.dot_dimension_numbers<[1], [0], [0], [1], [0, 0, 1, 1], [], []>} : vector<16x128xbf16>, vector<128x512xbf16>, vector<16x512xf32> -> vector<16x512xf32>
    %c0_4 = arith.constant 0 : index
    %c0_5 = arith.constant 0 : index
    %7 = vector.load %arg4[%c0_4, %c0_5] : memref<1x512xf32, #tpu.memory_space<vmem>>, vector<1x512xf32>
    %8 = vector.broadcast %7 : vector<1x512xf32> to vector<16x512xf32>
    %9 = arith.addf %6, %8 : vector<16x512xf32>
    %cst_6 = arith.constant 5.000000e-01 : f32
    %10 = vector.broadcast %cst_6 : f32 to vector<16x512xf32>
    %11 = arith.mulf %10, %9 : vector<16x512xf32>
    %cst_7 = arith.constant 0.707106769 : f32
    %12 = vector.broadcast %cst_7 : f32 to vector<16x512xf32>
    %13 = arith.mulf %9, %12 : vector<16x512xf32>
    %14 = math.erf %13 : vector<16x512xf32>
    %cst_8 = arith.constant 1.000000e+00 : f32
    %15 = vector.broadcast %cst_8 : f32 to vector<16x512xf32>
    %16 = arith.addf %15, %14 : vector<16x512xf32>
    %17 = arith.mulf %11, %16 : vector<16x512xf32>
    %c0_9 = arith.constant 0 : index
    %c0_10 = arith.constant 0 : index
    %18 = vector.load %arg8[%c0_9, %c0_10] : memref<16x128xf32, #tpu.memory_space<vmem>>, vector<16x128xf32>
    %19 = arith.truncf %17 : vector<16x512xf32> to vector<16x512xbf16>
    %c0_11 = arith.constant 0 : index
    %c0_12 = arith.constant 0 : index
    %20 = vector.load %arg5[%c0_11, %c0_12] : memref<512x128xbf16, #tpu.memory_space<vmem>>, vector<512x128xbf16>
    %cst_13 = arith.constant dense<0.000000e+00> : vector<16x128xf32>
    %21 = tpu.matmul %19, %20, %cst_13 {dimension_numbers = #tpu.dot_dimension_numbers<[1], [0], [0], [1], [0, 0, 1, 1], [], []>} : vector<16x512xbf16>, vector<512x128xbf16>, vector<16x128xf32> -> vector<16x128xf32>
    %22 = arith.addf %18, %21 : vector<16x128xf32>
    %c0_14 = arith.constant 0 : index
    %c0_15 = arith.constant 0 : index
    %23 = vector.load %arg8[%c0_14, %c0_15] : memref<16x128xf32, #tpu.memory_space<vmem>>, vector<16x128xf32>
    tpu.vector_store %arg8[%c0_14, %c0_15], %22 {strides = array<i32>} : memref<16x128xf32, #tpu.memory_space<vmem>>, vector<16x128xf32>,
    %c0_i32_16 = arith.constant 0 : i32
    %24 = arith.cmpi eq, %arg1, %c0_i32_16 : i32
    %25 = arith.extui %24 : i1 to i32
    %c0_i32_17 = arith.constant 0 : i32
    %26 = arith.cmpi ne, %25, %c0_i32_17 : i32
    scf.if %26 {
      %c0_18 = arith.constant 0 : index
      %c0_19 = arith.constant 0 : index
      %27 = vector.load %arg8[%c0_18, %c0_19] : memref<16x128xf32, #tpu.memory_space<vmem>>, vector<16x128xf32>
      %c0_20 = arith.constant 0 : index
      %c0_21 = arith.constant 0 : index
      %28 = vector.load %arg6[%c0_20, %c0_21] : memref<1x128xf32, #tpu.memory_space<vmem>>, vector<1x128xf32>
      %29 = vector.broadcast %28 : vector<1x128xf32> to vector<16x128xf32>
      %30 = arith.addf %27, %29 : vector<16x128xf32>
      %c0_22 = arith.constant 0 : index
      %c0_23 = arith.constant 0 : index
      %31 = vector.load %arg7[%c0_22, %c0_23] : memref<16x128xf32, #tpu.memory_space<vmem>>, vector<16x128xf32>
      tpu.vector_store %arg7[%c0_22, %c0_23], %30 {strides = array<i32>} : memref<16x128xf32, #tpu.memory_space<vmem>>, vector<16x128xf32>,
    } else {
    }
    return
  }
  func.func @transform_0(%arg0: i32, %arg1: i32) -> (i32, i32) {
    %c0_i32 = arith.constant 0 : i32
    %c0_i32_0 = arith.constant 0 : i32
    return %arg0, %c0_i32 : i32, i32
  }
  func.func @transform_1(%arg0: i32, %arg1: i32) -> (i32, i32) {
    %c0_i32 = arith.constant 0 : i32
    %c0_i32_0 = arith.constant 0 : i32
    return %c0_i32, %arg1 : i32, i32
  }
  func.func @transform_2(%arg0: i32, %arg1: i32) -> (i32, i32) {
    %c0_i32 = arith.constant 0 : i32
    %c0_i32_0 = arith.constant 0 : i32
    return %c0_i32, %arg1 : i32, i32
  }
  func.func @transform_3(%arg0: i32, %arg1: i32) -> (i32, i32) {
    %c0_i32 = arith.constant 0 : i32
    %c0_i32_0 = arith.constant 0 : i32
    return %arg1, %c0_i32 : i32, i32
  }
  func.func @transform_4(%arg0: i32, %arg1: i32) -> (i32, i32) {
    %c0_i32 = arith.constant 0 : i32
    %c0_i32_0 = arith.constant 0 : i32
    %c0_i32_1 = arith.constant 0 : i32
    return %c0_i32, %c0_i32_0 : i32, i32
  }
  func.func @transform_5(%arg0: i32, %arg1: i32) -> (i32, i32) {
    %c0_i32 = arith.constant 0 : i32
    %c0_i32_0 = arith.constant 0 : i32
    return %arg0, %c0_i32 : i32, i32
  }
}

</mosaic_0001>

<bundles_post_ra>
// kernel: mlp_forward.1
= control target key start
LH: loop header
LB: loop body
LE: loop exit
PB: predicated region body
PF: predicated region fallthrough
CT: control target
= control target key end

     0   :  { %v982_v2 = vmov 0   ;;  %s1223_s0 = inlined_call_operand.vmem [shape: f32[16,128], index: 0, kind: input, shape index: {}]   ;;  %s1224_s1 = inlined_call_operand.vmem [shape: bf16[128,512], index: 1, kind: input, shape index: {}]   ;;  %s1225_s2 = inlined_call_operand.vmem [shape: f32[1,512], index: 2, kind: input, shape index: {}]   ;;  %s1226_s3 = inlined_call_operand.vmem [shape: bf16[512,128], index: 3, kind: input, shape index: {}]   ;;  %s1227_s4 = inlined_call_operand.vmem [shape: f32[1,128], index: 4, kind: input, shape index: {}]   ;;  %s1228_s5 = inlined_call_operand.hbm [shape: f32[16,128], index: 5, kind: output, shape index: {}]  }
   0x1   :  { %v864_v0 = vld [vmem:[%s1224_s1 + $0xe4] ss:$16 sps:$4 sm:$0xff]   ;;  %v866_v1 = vld [vmem:[%s1224_s1 + $0xec] ss:$16 sps:$4 sm:$0xff]   ;;  %277 = vmatprep.mubr.bf16.mxu0 %v982_v2  ;;  %320 = vmatprep.mubr.bf16.mxu1 %v982_v2  ;;  %v868_v3 = vld [vmem:[%s1224_s1 + $0xe0] ss:$16 sps:$4 sm:$0xff]  }
   0x2   :  { %245 = vmatprep.subr.bf16.mxu0 %v864_v0  ;;  %v869_v4 = vld [vmem:[%s1224_s1 + $0xe8] ss:$16 sps:$4 sm:$0xff]   ;;  %288 = vmatprep.subr.bf16.mxu1 %v866_v1  ;;  %v870_v5 = vld [vmem:[%s1224_s1 + $0xc4] ss:$16 sps:$4 sm:$0xff]   ;;  %v872_v6 = vld [vmem:[%s1224_s1 + $0xcc] ss:$16 sps:$4 sm:$0xff]  }
   0x3   :  { %246 = vmatpush1.bf16.msra.mxu0 %v868_v3  ;;  %289 = vmatpush1.bf16.msra.mxu1 %v869_v4  ;;  %v874_v7 = vld [vmem:[%s1224_s1 + $0xc0] ss:$16 sps:$4 sm:$0xff]   ;;  %v875_v8 = vld [vmem:[%s1224_s1 + $0xc8] ss:$16 sps:$4 sm:$0xff]   ;;  %v876_v9 = vld [vmem:[%s1224_s1 + $0xa4] ss:$16 sps:$4 sm:$0xff]  }
   0x4   :  { %247 = vmatprep.subr.bf16.mxu0 %v870_v5  ;;  %290 = vmatprep.subr.bf16.mxu1 %v872_v6  ;;  %v878_v10 = vld [vmem:[%s1224_s1 + $0xac] ss:$16 sps:$4 sm:$0xff]   ;;  %v880_v11 = vld [vmem:[%s1224_s1 + $0xa0] ss:$16 sps:$4 sm:$0xff]   ;;  %v881_v12 = vld [vmem:[%s1224_s1 + $0xa8] ss:$16 sps:$4 sm:$0xff]  }
   0x5   :  { %v882_v13 = vld [vmem:[%s1224_s1 + $0x84] ss:$16 sps:$4 sm:$0xff]   ;;  %v884_v14 = vld [vmem:[%s1224_s1 + $0x8c] ss:$16 sps:$4 sm:$0xff]   ;;  %v886_v15 = vld [vmem:[%s1224_s1 + $0x80] ss:$16 sps:$4 sm:$0xff]  }
   0x6   :  { %v887_v16 = vld [vmem:[%s1224_s1 + $0x88] ss:$16 sps:$4 sm:$0xff]   ;;  %v888_v17 = vld [vmem:[%s1224_s1 + $0x64] ss:$16 sps:$4 sm:$0xff]   ;;  %v890_v18 = vld [vmem:[%s1224_s1 + $0x6c] ss:$16 sps:$4 sm:$0xff]  }
   0x7   :  { %248 = vmatpush1.bf16.msra.mxu0 %v874_v7  ;;  %291 = vmatpush1.bf16.msra.mxu1 %v875_v8  ;;  %v892_v19 = vld [vmem:[%s1224_s1 + $0x60] ss:$16 sps:$4 sm:$0xff]   ;;  %v893_v20 = vld [vmem:[%s1224_s1 + $0x68] ss:$16 sps:$4 sm:$0xff]   ;;  %v894_v21 = vld [vmem:[%s1224_s1 + $0x44] ss:$16 sps:$4 sm:$0xff]  }
   0x8   :  { %249 = vmatprep.subr.bf16.mxu0 %v876_v9  ;;  %292 = vmatprep.subr.bf16.mxu1 %v878_v10  ;;  %v896_v22 = vld [vmem:[%s1224_s1 + $0x4c] ss:$16 sps:$4 sm:$0xff]   ;;  %v898_v23 = vld [vmem:[%s1224_s1 + $0x40] ss:$16 sps:$4 sm:$0xff]   ;;  %v899_v24 = vld [vmem:[%s1224_s1 + $0x48] ss:$16 sps:$4 sm:$0xff]  }
   0x9   :  { %v900_v25 = vld [vmem:[%s1224_s1 + $0x24] ss:$16 sps:$4 sm:$0xff]   ;;  %v902_v26 = vld [vmem:[%s1224_s1 + $0x2c] ss:$16 sps:$4 sm:$0xff]   ;;  %v904_v27 = vld [vmem:[%s1224_s1 + $0x20] ss:$16 sps:$4 sm:$0xff]  }
   0xa   :  { %v905_v28 = vld [vmem:[%s1224_s1 + $0x28] ss:$16 sps:$4 sm:$0xff]   ;;  %v906_v29 = vld [vmem:[%s1224_s1 + $0x4] ss:$16 sps:$4 sm:$0xff]   ;;  %v908_v30 = vld [vmem:[%s1224_s1 + $0xc] ss:$16 sps:$4 sm:$0xff]  }
   0xb   :  { %250 = vmatpush1.bf16.msra.mxu0 %v880_v11  ;;  %293 = vmatpush1.bf16.msra.mxu1 %v881_v12  ;;  %v910_v31 = vld [vmem:[%s1224_s1] ss:$16 sps:$4 sm:$0xff]   ;;  %v911_v32 = vld [vmem:[%s1224_s1 + $0x8] ss:$16 sps:$4 sm:$0xff]  }
   0xc   :  { %251 = vmatprep.subr.bf16.mxu0 %v882_v13  ;;  %294 = vmatprep.subr.bf16.mxu1 %v884_v14  ;;  %v28_v33 = vld [vmem:[%s1223_s0] sm:$0xff]  ;;  %v29_v34 = vld [vmem:[%s1223_s0 + $0x8] sm:$0xff] }
   0xd   :  { %v30_v35 = vpack.c.bf16 %v29_v34, %v28_v33 }
   0xf   :  { %252 = vmatpush1.bf16.msra.mxu0 %v886_v15  ;;  %295 = vmatpush1.bf16.msra.mxu1 %v887_v16 }
  0x10   :  { %253 = vmatprep.subr.bf16.mxu0 %v888_v17  ;;  %296 = vmatprep.subr.bf16.mxu1 %v890_v18 }
  0x13   :  { %254 = vmatpush1.bf16.msra.mxu0 %v892_v19  ;;  %297 = vmatpush1.bf16.msra.mxu1 %v893_v20 }
  0x14   :  { %255 = vmatprep.subr.bf16.mxu0 %v894_v21  ;;  %298 = vmatprep.subr.bf16.mxu1 %v896_v22 }
  0x17   :  { %256 = vmatpush1.bf16.msra.mxu0 %v898_v23  ;;  %299 = vmatpush1.bf16.msra.mxu1 %v899_v24 }
  0x18   :  { %257 = vmatprep.subr.bf16.mxu0 %v900_v25  ;;  %300 = vmatprep.subr.bf16.mxu1 %v902_v26 }
  0x1b   :  { %258 = vmatpush1.bf16.msra.mxu0 %v904_v27  ;;  %301 = vmatpush1.bf16.msra.mxu1 %v905_v28 }
  0x1c   :  { %259 = vmatprep.subr.bf16.mxu0 %v906_v29  ;;  %302 = vmatprep.subr.bf16.mxu1 %v908_v30 }
  0x1f   :  { %260 = vmatpush1.bf16.msra.mxu0 %v910_v31  ;;  %303 = vmatpush1.bf16.msra.mxu1 %v911_v32 }
  0x22   :  { %278 = vmatmul.mubr.bf16.vlgmr.msra.gmra.mxu0 %v30_v35  ;;  %321 = vmatmul.mubr.bf16.vlgmr.msra.gmra.mxu1 %v30_v35 }
  0x23   :  { %10 = vsyncpa [#allocation4], 0  ;;  %v912_v36 = vld [vmem:[%s1226_s3 + $0x78] sm:$0xff]   ;;  %v916_v40 = vld [vmem:[%s1226_s3 + $0x70] sm:$0xff]   ;;  %v65_v4 = vlaneseq  ;;  %s983_s21 = smov [#allocation3]  }
  0x24   :  { %v913_v37 = vld [vmem:[%s1226_s3 + $0xf8] sm:$0xff]   ;;  %816 = vmatprep.subr.bf16.mxu0 %v912_v36  ;;  %v917_v41 = vld [vmem:[%s1226_s3 + $0xf0] sm:$0xff]   ;;  %v920_v44 = vld [vmem:[%s1226_s3 + $0x68] sm:$0xff]   ;;  %s740_s22 = sshll.u32 %s983_s21, 4  ;;  %s741_s22 = int_to_ptr.vmem [resolvable:$true] %s740_s22 }
  0x25   :  { %v914_v38 = vld [vmem:[%s1226_s3 + $0x38] sm:$0xff]   ;;  %838 = vmatprep.subr.bf16.mxu1 %v913_v37  ;;  %v918_v42 = vld [vmem:[%s1226_s3 + $0x30] sm:$0xff]   ;;  %v921_v45 = vld [vmem:[%s1226_s3 + $0xe8] sm:$0xff]   ;;  %v66_v5 = vshrl.u32 %v65_v4, 7  ;;  %s960_s23 = scalar_lea.vmem %s741_s22, 256  ;;  %p965_p1 = scmp.lt.s32.totalorder %s741_s22, %s741_s22 }
  0x26   :  { %v915_v39 = vld [vmem:[%s1226_s3 + $0xb8] sm:$0xff]   ;;  %817 = vmatpush3.bf16.msra.mxu0 %v914_v38  ;;  %v919_v43 = vld [vmem:[%s1226_s3 + $0xb0] sm:$0xff]   ;;  %v922_v46 = vld [vmem:[%s1226_s3 + $0x28] sm:$0xff]   ;;  %p961_p0 = scmp.ne.s32.totalorder %s741_s22, %s960_s23  ;;  %p966_p2 = scmp.lt.s32.totalorder %s960_s23, %s960_s23 }
  0x27   :  { %839 = vmatpush3.bf16.msra.mxu1 %v915_v39  ;;  %818 = vmatprep.subr.bf16.mxu0 %v916_v40  ;;  %v923_v47 = vld [vmem:[%s1226_s3 + $0xa8] sm:$0xff]   ;;  %v924_v48 = vld [vmem:[%s1226_s3 + $0x60] sm:$0xff]   ;;  %v928_v52 = vld [vmem:[%s1226_s3 + $0x58] sm:$0xff]   ;;  %v67_v6 = vsub.s32 0, %v66_v5  ;;  %v75_v7 = vsub.s32 2, %v66_v5  ;;  %v71_v9 = vsub.s32 1, %v66_v5 }
  0x28   :  { %840 = vmatprep.subr.bf16.mxu1 %v917_v41  ;;  %v925_v49 = vld [vmem:[%s1226_s3 + $0xe0] sm:$0xff]   ;;  %v929_v53 = vld [vmem:[%s1226_s3 + $0xd8] sm:$0xff]   ;;  %v932_v56 = vld [vmem:[%s1226_s3 + $0x50] sm:$0xff]   ;;  %v79_v10 = vsub.s32 3, %v66_v5  ;;  %p967_p3 = por %p966_p2, %p965_p1 }
  0x29   :  { %v926_v50 = vld [vmem:[%s1226_s3 + $0x20] sm:$0xff]   ;;  %v930_v54 = vld [vmem:[%s1226_s3 + $0x18] sm:$0xff]   ;;  %v933_v57 = vld [vmem:[%s1226_s3 + $0xd0] sm:$0xff]  }
  0x2a   :  { %819 = vmatpush3.bf16.msra.mxu0 %v918_v42  ;;  %v927_v51 = vld [vmem:[%s1226_s3 + $0xa0] sm:$0xff]   ;;  %v931_v55 = vld [vmem:[%s1226_s3 + $0x98] sm:$0xff]   ;;  %v934_v58 = vld [vmem:[%s1226_s3 + $0x10] sm:$0xff]   ;;  %p968_p4 = pnand %p967_p3, %p961_p0 }
  0x2b   :  { %841 = vmatpush3.bf16.msra.mxu1 %v919_v43  ;;  %820 = vmatprep.subr.bf16.mxu0 %v920_v44  ;;  %v935_v59 = vld [vmem:[%s1226_s3 + $0x90] sm:$0xff]   ;;  %v936_v60 = vld [vmem:[%s1226_s3 + $0x48] sm:$0xff]   ;;  %v940_v0 = vld [vmem:[%s1226_s3 + $0x40] sm:$0xff]  }
  0x2c   :  { %842 = vmatprep.subr.bf16.mxu1 %v921_v45  ;;  %v937_v61 = vld [vmem:[%s1226_s3 + $0xc8] sm:$0xff]   ;;  %v941_v1 = vld [vmem:[%s1226_s3 + $0xc0] sm:$0xff]  }
  0x2d   :  { %v938_v62 = vld [vmem:[%s1226_s3 + $0x8] sm:$0xff]   ;;  %v942_v2 = vld [vmem:[%s1226_s3] sm:$0xff]  }
  0x2e   :  { %821 = vmatpush3.bf16.msra.mxu0 %v922_v46  ;;  %v939_v63 = vld [vmem:[%s1226_s3 + $0x88] sm:$0xff]   ;;  %v943_v3 = vld [vmem:[%s1226_s3 + $0x80] sm:$0xff]  }
  0x2f   :  { %843 = vmatpush3.bf16.msra.mxu1 %v923_v47  ;;  %822 = vmatprep.subr.bf16.mxu0 %v924_v48  ;;  %v63_v8 = vld [vmem:[%s1225_s2] sm:$0xf] }
  0x30   :  { %844 = vmatprep.subr.bf16.mxu1 %v925_v49  ;;  %v68_v11 = vrot.slane %v63_v8, %v67_v6  ;;  %v76_v12 = vrot.slane %v63_v8, %v75_v7  ;;  %v72_v15 = vrot.slane %v63_v8, %v71_v9  ;;  %v80_v16 = vrot.slane %v63_v8, %v79_v10 }
  0x32   :  { %823 = vmatpush3.bf16.msra.mxu0 %v926_v50 }
  0x33   :  { %845 = vmatpush3.bf16.msra.mxu1 %v927_v51  ;;  %824 = vmatprep.subr.bf16.mxu0 %v928_v52 }
  0x34   :  { %846 = vmatprep.subr.bf16.mxu1 %v929_v53 }
  0x36   :  { %825 = vmatpush3.bf16.msra.mxu0 %v930_v54 }
  0x37   :  { %847 = vmatpush3.bf16.msra.mxu1 %v931_v55  ;;  %826 = vmatprep.subr.bf16.mxu0 %v932_v56 }
  0x38   :  { %848 = vmatprep.subr.bf16.mxu1 %v933_v57 }
  0x3a   :  { %827 = vmatpush3.bf16.msra.mxu0 %v934_v58 }
  0x3b   :  { %849 = vmatpush3.bf16.msra.mxu1 %v935_v59  ;;  %828 = vmatprep.subr.bf16.mxu0 %v936_v60 }
  0x3c   :  { %850 = vmatprep.subr.bf16.mxu1 %v937_v61 }
  0x3e   :  { %829 = vmatpush3.bf16.msra.mxu0 %v938_v62 }
  0x3f   :  { %851 = vmatpush3.bf16.msra.mxu1 %v939_v63  ;;  %830 = vmatprep.subr.bf16.mxu0 %v940_v0 }
  0x40   :  { %852 = vmatprep.subr.bf16.mxu1 %v941_v1 }
  0x42   :  { %831 = vmatpush3.bf16.msra.mxu0 %v942_v2 }
  0x43   :  { %853 = vmatpush3.bf16.msra.mxu1 %v943_v3 }
  0xe2   :  { %v279_v13 = vpop.f32.mrf.mxu0  ;;  %v322_v14 = vpop.f32.mrf.mxu1 }
  0xe3   :  { %v280_v17 = vadd.f32 %v279_v13, %v68_v11  ;;  %v323_v18 = vadd.f32 %v322_v14, %v76_v12 }
  0xe4   :  { %v281_v19 = vpop.f32.mrf.mxu0  ;;  %v324_v20 = vpop.f32.mrf.mxu1 }
  0xe5   :  { %v339_v21 = vmul.f32 0.70710677, %v280_v17  ;;  %v341_v22 = vmul.f32 0.70710677, %v323_v18  ;;  %v282_v23 = vadd.f32 %v281_v19, %v72_v15  ;;  %v325_v24 = vadd.f32 %v324_v20, %v80_v16 }
  0xe6   :  { %v283_v25 = vpop.f32.mrf.mxu0  ;;  %v326_v26 = vpop.f32.mrf.mxu1  ;;  %v331_v45 = vmul.f32 0.5, %v280_v17  ;;  %v333_v63 = vmul.f32 0.5, %v323_v18  ;;  %v815_v18 = vld [vmem:[%s1227_s4] ss:$0 sm:$0xff] }
  0xe7   :  { %v284_v27 = vadd.f32 %v283_v25, %v68_v11  ;;  %v327_v28 = vadd.f32 %v326_v26, %v76_v12  ;;  %944 = verf.f32 %v339_v21  ;;  %v340_v29 = vmul.f32 0.70710677, %v282_v23 }
  0xe8   :  { %v285_v30 = vpop.f32.mrf.mxu0  ;;  %v328_v31 = vpop.f32.mrf.mxu1  ;;  %946 = verf.f32 %v341_v22  ;;  %v342_v32 = vmul.f32 0.70710677, %v325_v24  ;;  %v332_v46 = vmul.f32 0.5, %v282_v23  ;;  %v334_v59 = vmul.f32 0.5, %v325_v24 }
  0xe9   :  { %v343_v33 = vmul.f32 0.70710677, %v284_v27  ;;  %948 = verf.f32 %v340_v29  ;;  %v345_v34 = vmul.f32 0.70710677, %v327_v28  ;;  %v286_v35 = vadd.f32 %v285_v30, %v72_v15 }
  0xea   :  { %v329_v36 = vadd.f32 %v328_v31, %v80_v16  ;;  %950 = verf.f32 %v342_v32  ;;  %v335_v52 = vmul.f32 0.5, %v284_v27  ;;  %v337_v56 = vmul.f32 0.5, %v327_v28 }
  0xeb   :  { %952 = verf.f32 %v343_v33  ;;  %v344_v37 = vmul.f32 0.70710677, %v286_v35  ;;  %v336_v57 = vmul.f32 0.5, %v286_v35 }
  0xec   :  { %954 = verf.f32 %v345_v34  ;;  %v346_v38 = vmul.f32 0.70710677, %v329_v36  ;;  %v338_v61 = vmul.f32 0.5, %v329_v36 }
  0xed   :  { %956 = verf.f32 %v344_v37 }
  0xee   :  { %958 = verf.f32 %v346_v38 }
  0xf4   :  { %v945_v39 = vpop.eup %944 }
  0xf5   :  { %v947_v40 = vpop.eup %946  ;;  %v355_v50 = vadd.f32 1.0, %v945_v39 }
  0xf6   :  { %v949_v41 = vpop.eup %948  ;;  %v357_v55 = vadd.f32 1.0, %v947_v40 }
  0xf7   :  { %v951_v42 = vpop.eup %950  ;;  %v356_v47 = vadd.f32 1.0, %v949_v41  ;;  %v363_v3 = vmul.f32 %v355_v50, %v331_v45 }
  0xf8   :  { %v953_v43 = vpop.eup %952  ;;  %v358_v51 = vadd.f32 1.0, %v951_v42  ;;  %v365_v6 = vmul.f32 %v357_v55, %v333_v63 }
  0xf9   :  { %v955_v44 = vpop.eup %954  ;;  %v359_v48 = vadd.f32 1.0, %v953_v43  ;;  %v364_v0 = vmul.f32 %v356_v47, %v332_v46 }
  0xfa   :  { %v957_v49 = vpop.eup %956  ;;  %v361_v53 = vadd.f32 1.0, %v955_v44  ;;  %v366_v4 = vmul.f32 %v358_v51, %v334_v59 }
  0xfb   :  { %v959_v54 = vpop.eup %958  ;;  %v360_v58 = vadd.f32 1.0, %v957_v49  ;;  %v367_v60 = vmul.f32 %v359_v48, %v335_v52 }
  0xfc   :  { %v362_v62 = vadd.f32 1.0, %v959_v54  ;;  %v369_v1 = vmul.f32 %v361_v53, %v337_v56 }
  0xfd   :  { %v368_v2 = vmul.f32 %v360_v58, %v336_v57  ;;  %v373_v8 = vpack.c.bf16 %v367_v60, %v363_v3 }
  0xfe   :  { %v370_v5 = vmul.f32 %v362_v62, %v338_v61  ;;  %v375_v10 = vpack.c.bf16 %v369_v1, %v365_v6 }
  0xff   :  { %v374_v7 = vpack.c.bf16 %v368_v2, %v364_v0 }
 0x100   :  { %v376_v9 = vpack.c.bf16 %v370_v5, %v366_v4 }
 0x101   :  { %665 = vmatprep.mubr.bf16.mxu0 %v374_v7 }
 0x102   :  { %706 = vmatprep.mubr.bf16.mxu1 %v376_v9  ;;  %666 = vmatmul.mubr.bf16.vlgmr.msra.gmra.mxu0 %v373_v8 }
 0x103   :  { %707 = vmatmul.mubr.bf16.vlgmr.msra.gmra.mxu1 %v375_v10 }
 0x1c2   :  { %v832_v11 = vpop.f32.mrf.mxu0 }
 0x1c3   :  { %v854_v12 = vpop.f32.mrf.mxu1 }
 0x1c4   :  { %v833_v13 = vpop.f32.mrf.mxu0 }
 0x1c5   :  { %v834_v14 = vadd.f32 %v833_v13, %v832_v11  ;;  %v855_v15 = vpop.f32.mrf.mxu1 }
 0x1c6   :  { %v856_v16 = vadd.f32 %v855_v15, %v854_v12  ;;  %v835_v17 = vpop.f32.mrf.mxu0 }
 0x1c7   :  { %v857_v19 = vpop.f32.mrf.mxu1 }
 0x1c8   :  { %v709_v20 = vadd.f32 %v856_v16, %v834_v14  ;;  %v836_v21 = vpop.f32.mrf.mxu0 }
 0x1c9   :  { %v837_v22 = vadd.f32 %v836_v21, %v835_v17  ;;  %v858_v23 = vpop.f32.mrf.mxu1 }
 0x1ca   :  { %v731_v24 = vadd.f32 %v815_v18, %v709_v20  ;;  %v859_v25 = vadd.f32 %v858_v23, %v857_v19 }
 0x1cc   :  { %733 = vst [vmem:[#allocation3] sm:$0xff] %v731_v24  ;;  %v712_v26 = vadd.f32 %v859_v25, %v837_v22 }
 0x1ce   :  { %v732_v27 = vadd.f32 %v815_v18, %v712_v26 }
 0x1d0   :  { %734 = vst [vmem:[#allocation3 + $0x8] sm:$0xff] %v732_v27 }
 0x1d1   :  { %971 = shalt.err (!%p968_p4)
}
 0x1d2   :  { %s984_s4 = smov 128   ;;  %s985_s24 = smov 8  }
 0x1d3   :  { %746 = dma.vmem_to_hbm [thread:$0]  %s741_s22, 256, %s1228_s5, [#allocation4], %s984_s4, %s984_s4, %s985_s24  }
 0x1d4   :  { %980 = dma.done.wait [#allocation4], 256  }
 0x1d5   :  { %981 = vsyncadd [#allocation4], 4294967040 }
 0x1d6   :  { %750 = vsyncpa [#allocation4], 1 }

</bundles_post_ra>
